<compile_context>
chip_gen: v5e
topology: v5e:2x2
jax: 0.10.0
libtpu: 0.0.40
codegen_flags: <defaults>
</compile_context>

<pallas_src>
import jax
import jax.numpy as jnp
from jax.experimental import pallas as pl
from jax.experimental.pallas import tpu as pltpu


def _linear_kernel(x_ref, w_ref, b_ref, o_ref):
    # x_ref: (TB, D) VMEM tile, w_ref: (1, D) lane-dense VMEM row,
    # b_ref: (1,) SMEM scalar, o_ref: (TB, 1) VMEM output tile.
    x = x_ref[...].astype(jnp.float32)          # (TB, D)
    w = w_ref[...].astype(jnp.float32)          # (1, D) broadcast over sublanes
    # VPU elementwise multiply + XLU cross-lane reduce (MXU left idle on purpose:
    # an N=1 RHS would use <1% of the systolic array).
    acc = jnp.sum(x * w, axis=-1, keepdims=True)   # (TB, 1) f32
    o_ref[...] = (acc + b_ref[0]).astype(o_ref.dtype)


def logistic_regression_forward(x, weight, bias, *, tile_rows=None):
    """x: (B, D) f32, weight: (1, D) f32 (PyTorch Linear layout), bias: (1,) f32.

    Returns (B, 1), matching nn.Linear(input_dim, 1)(x).
    """
    B, D = x.shape
    assert weight.shape == (1, D)
    assert bias.shape == (1,)

    if tile_rows is None:
        # ~4 MiB per x buffer -> 2 double-buffered tiles stay under v5e's
        # 16 MiB scoped-VMEM default (and far under v6e/v7x limits).
        budget_rows = max(8, (4 * 1024 * 1024) // (D * 4))
        tile_rows = min(1024, budget_rows)
    # Don't tile wider than the (sublane-rounded) batch itself.
    tile_rows = min(tile_rows, ((B + 7) // 8) * 8)
    tile_rows = max(8, (tile_rows // 8) * 8)       # sublane multiple

    num_tiles = pl.cdiv(B, tile_rows)
    b_pad = num_tiles * tile_rows
    if b_pad != B:
        x = jnp.pad(x, ((0, b_pad - B), (0, 0)))   # tail tile handled by padding

    out = pl.pallas_call(
        _linear_kernel,
        out_shape=jax.ShapeDtypeStruct((b_pad, 1), x.dtype),
        grid=(num_tiles,),
        in_specs=[
            pl.BlockSpec((tile_rows, D), lambda i: (i, 0)),           # streamed x tiles
            pl.BlockSpec((1, D), lambda i: (0, 0)),                   # weight, resident
            pl.BlockSpec(memory_space=pltpu.MemorySpace.SMEM),        # bias scalar
        ],
        out_specs=pl.BlockSpec((tile_rows, 1), lambda i: (i, 0)),
        compiler_params=pltpu.CompilerParams(
            dimension_semantics=("parallel",),     # shard batch tiles across TCs on v7x
        ),
    )(x, weight, bias)

    return out[:B]


if __name__ == "__main__":
    key = jax.random.PRNGKey(0)
    k_x, k_w, k_b = jax.random.split(key, 3)

    batch, input_dim = 8, 32

    # Deterministic parameter init mimicking nn.Linear's uniform(-1/sqrt(D), 1/sqrt(D)).
    bound = 1.0 / (input_dim ** 0.5)
    weight = jax.random.uniform(k_w, (1, input_dim), jnp.float32, -bound, bound)
    bias = jax.random.uniform(k_b, (1,), jnp.float32, -bound, bound)

    x = jax.random.normal(k_x, (batch, input_dim), jnp.float32)

    y = logistic_regression_forward(x, weight, bias)
    y = jax.block_until_ready(y)

    # Reference check against plain JAX (same math as PyTorch Linear).
    y_ref = x @ weight.T + bias
    assert y.shape == (batch, 1)
    assert jnp.allclose(y, y_ref, atol=1e-5, rtol=1e-5)

    print("KERNEL_OK")
</pallas_src>

<mosaic_0001>
module attributes {stable_mosaic.version = 11 : i64} {
  func.func @_linear_kernel(%arg0: i32, %arg1: memref<8x32xf32, #tpu.memory_space<vmem>>, %arg2: memref<1x32xf32, #tpu.memory_space<vmem>>, %arg3: memref<1xf32, #tpu.memory_space<smem>>, %arg4: memref<8x1xf32, #tpu.memory_space<vmem>>) attributes {dimension_semantics = [#tpu.dimension_semantics<parallel>], iteration_bounds = array<i64: 1>, scalar_prefetch = 0 : i64, scratch_operands = 0 : i64, tpu.core_type = #tpu.core_type<tc>, window_params = [{transform_indices = @transform_0, window_bounds = array<i64: 8, 32>}, {pipeline_mode = #tpu.pipeline_mode<synchronous>, transform_indices = @transform_1, window_bounds = array<i64: 1, 32>}, {transform_indices = @transform_2, window_bounds = array<i64: 1>}, {transform_indices = @transform_3, window_bounds = array<i64: 8, 1>}]} {
    %c0 = arith.constant 0 : index
    %c0_0 = arith.constant 0 : index
    %0 = vector.load %arg1[%c0, %c0_0] : memref<8x32xf32, #tpu.memory_space<vmem>>, vector<8x32xf32>
    %c0_1 = arith.constant 0 : index
    %c0_2 = arith.constant 0 : index
    %1 = vector.load %arg2[%c0_1, %c0_2] : memref<1x32xf32, #tpu.memory_space<vmem>>, vector<1x32xf32>
    %2 = vector.broadcast %1 : vector<1x32xf32> to vector<8x32xf32>
    %3 = arith.mulf %0, %2 : vector<8x32xf32>
    %cst = arith.constant dense<0.000000e+00> : vector<8xf32>
    %4 = vector.multi_reduction <add>, %3, %cst [1] : vector<8x32xf32> to vector<8xf32>
    %5 = vector.shape_cast %4 : vector<8xf32> to vector<8x1xf32>
    %c0_3 = arith.constant 0 : index
    %6 = memref.load %arg3[%c0_3] : memref<1xf32, #tpu.memory_space<smem>>
    %7 = vector.broadcast %6 : f32 to vector<8x1xf32>
    %8 = arith.addf %5, %7 : vector<8x1xf32>
    %c0_4 = arith.constant 0 : index
    %c0_5 = arith.constant 0 : index
    %9 = vector.load %arg4[%c0_4, %c0_5] : memref<8x1xf32, #tpu.memory_space<vmem>>, vector<8x1xf32>
    tpu.vector_store %arg4[%c0_4, %c0_5], %8 {strides = array<i32>} : memref<8x1xf32, #tpu.memory_space<vmem>>, vector<8x1xf32>,
    return
  }
  func.func @transform_0(%arg0: i32) -> (i32, i32) {
    %c0_i32 = arith.constant 0 : i32
    %c0_i32_0 = arith.constant 0 : i32
    return %arg0, %c0_i32 : i32, i32
  }
  func.func @transform_1(%arg0: i32) -> (i32, i32) {
    %c0_i32 = arith.constant 0 : i32
    %c0_i32_0 = arith.constant 0 : i32
    %c0_i32_1 = arith.constant 0 : i32
    return %c0_i32, %c0_i32_0 : i32, i32
  }
  func.func @transform_2(%arg0: i32) -> i32 {
    %c0_i32 = arith.constant 0 : i32
    %c0_i32_0 = arith.constant 0 : i32
    return %c0_i32 : i32
  }
  func.func @transform_3(%arg0: i32) -> (i32, i32) {
    %c0_i32 = arith.constant 0 : i32
    %c0_i32_0 = arith.constant 0 : i32
    return %arg0, %c0_i32 : i32, i32
  }
}

</mosaic_0001>

<bundles_post_ra>
// kernel: tpu_custom_call.1
= control target key start
LH: loop header
LB: loop body
LE: loop exit
PB: predicated region body
PF: predicated region fallthrough
CT: control target
= control target key end

     0   :  { %9 = vsyncpa [#allocation4], 0  ;;  %s77_s15 = smov [#allocation3]   ;;  %s110_s0 = inlined_call_operand.hbm [shape: f32[8,32], index: 0, kind: input, shape index: {}]   ;;  %s111_s1 = inlined_call_operand.vmem [shape: f32[1,32], index: 1, kind: input, shape index: {}]   ;;  %s112_s2 = inlined_call_operand.<no memory space> [shape: f32[1], index: 2, kind: input, shape index: {}]   ;;  %s113_s3 = inlined_call_operand.vmem [shape: f32[8,1], index: 3, kind: output, shape index: {}]  }
   0x1   :  { %s15_s14 = sshll.u32 %s110_s0, 4  ;;  %s17_s16 = sshll.u32 %s77_s15, 4  ;;  %s16_s14 = int_to_ptr.hbm [resolvable:$true] %s15_s14  ;;  %s18_s16 = int_to_ptr.vmem [resolvable:$true] %s17_s16 }
   0x2   :  { %20 = dma.hbm_to_vmem [thread:$0]  %s16_s14, 128, %s18_s16, [#allocation4]  }
   0x3   :  { %75 = dma.done.wait [#allocation4], 128  }
   0x4   :  { %76 = vsyncadd [#allocation4], 4294967168  ;;  %v29_v0 = vld [vmem:[#allocation3] sm:$0xff]  ;;  %vm35_vm0 = vcmask 261120   ;;  %v40_v4 = vstv %s112_s2  ;;  %vm42_vm1 = vcmask 7168  }
   0x5   :  { %v50_v1 = vld [vmem:[%s111_s1] ss:$0 sm:$0xff] }
   0x6   :  { %v34_v2 = vmul.f32 %v50_v1, %v29_v0 }
   0x8   :  { %v36_v3 = vsel %vm35_vm0, %v34_v2, 0.0 }
   0x9   :  { %37 = vadd.xlane.f32.xlu0 %v36_v3 }
  0x7c   :  { %v38_v5 = vpop.xlane.xlu0 %37 }
  0x7d   :  { %v41_v6 = vadd.f32 %v40_v4, %v38_v5 }
  0x7f   :  { %43 = vst.msk [vmem:[%s113_s3] sm:$0xff] %vm42_vm1, %v41_v6 }
  0x80   :  { %48 = vsyncpa [#allocation4], 1 }

</bundles_post_ra>
